<compile_context>
chip_gen: v7x
topology: tpu7x:2x2x1
jax: 0.10.0
libtpu: 0.0.40
codegen_flags: <defaults>
</compile_context>

<pallas_src>
import math
import functools

import jax
import jax.numpy as jnp
from jax import lax
from jax.experimental import pallas as pl
from jax.experimental.pallas import tpu as pltpu


def _equal_conv1d_group_kernel(
    x_ref, w_ref, b_ref, o_ref, *,
    scale, bias_mult, negative_slope, activation, has_bias, ksize, l_out,
):
    """One batch element of the grouped (depthwise-expanded) conv.

    x_ref : (1, C_in, L)
    w_ref : (C_in, mult, K)        row-major reshape of (C_out, 1, K), C_out = C_in*mult
    b_ref : (C_in, mult, 1)
    o_ref : (1, C_in, mult, L_out) -> wrapper reshapes (free) to (B, C_out, L_out)

    `scale` / `bias_mult` are Python floats (compile-time immediates). When the
    activation is enabled they already carry ScaledLeakyReLU's sqrt(2)
    (leaky_relu is positively homogeneous: sqrt(2)*lrelu(z) == lrelu(sqrt(2)*z)).
    """
    x = x_ref[...]                          # (1, C_in, L)     f32
    w = w_ref[...] * scale                  # (C_in, mult, K)  scale the small operand

    # Unrolled K-tap depthwise conv: each tap is one VPU multiply-add over the
    # lane-dense (mult, L_out) tile; input channel c feeds output channels
    # oc = c*mult + m for m in [0, mult).
    acc = x[:, :, None, 0:l_out] * w[None, :, :, 0:1]
    for k in range(1, ksize):
        acc = acc + x[:, :, None, k:k + l_out] * w[None, :, :, k:k + 1]

    if has_bias:
        acc = acc + b_ref[...][None] * bias_mult          # broadcast over L_out

    if activation:
        # ScaledLeakyReLU(0.2); sqrt(2) already folded into scale/bias_mult.
        acc = jnp.maximum(acc, negative_slope * acc)

    o_ref[...] = acc.astype(o_ref.dtype)


def equal_conv1d_group(x, weight, bias=None, *, lr_mul=1.0,
                       activation=False, negative_slope=0.2):
    """Pallas wrapper mirroring EqualConv1dGroup.forward."""
    B, C_in, L = x.shape
    C_out, w_in, K = weight.shape
    assert w_in == 1 and C_out % C_in == 0, \
        "expects weight (C_out, 1, K) with C_out divisible by C_in (groups=C_in)"
    mult = C_out // C_in
    L_out = L - K + 1

    scale = (1.0 / math.sqrt(K)) * lr_mul
    bias_mult = lr_mul
    act = bool(activation)
    if act:
        # Fold ScaledLeakyReLU's sqrt(2) into the affine part (positive homogeneity).
        scale *= math.sqrt(2.0)
        bias_mult *= math.sqrt(2.0)

    has_bias = bias is not None
    w3 = weight.reshape(C_in, mult, K)      # row-major == PyTorch group ordering
    if has_bias:
        b3 = bias.reshape(C_in, mult, 1)
    else:
        b3 = jnp.zeros((C_in, mult, 1), x.dtype)

    kernel = functools.partial(
        _equal_conv1d_group_kernel,
        scale=float(scale),                 # Python floats -> baked immediates,
        bias_mult=float(bias_mult),         # no captured traced constants
        negative_slope=float(negative_slope),
        activation=act,
        has_bias=has_bias,
        ksize=int(K),
        l_out=int(L_out),
    )

    # TODO(synk): for large L, tile the length axis too (overlapping halo of K-1
    # samples per tile) to get DMA/compute pipelining; batch-only grid is enough
    # at these shapes and keeps every block equal to the full trailing dims.
    out4 = pl.pallas_call(
        kernel,
        out_shape=jax.ShapeDtypeStruct((B, C_in, mult, L_out), x.dtype),
        grid=(B,),
        in_specs=[
            pl.BlockSpec((1, C_in, L), lambda b: (b, 0, 0)),
            pl.BlockSpec((C_in, mult, K), lambda b: (0, 0, 0)),
            pl.BlockSpec((C_in, mult, 1), lambda b: (0, 0, 0)),
        ],
        out_specs=pl.BlockSpec((1, C_in, mult, L_out), lambda b: (b, 0, 0, 0)),
        compiler_params=pltpu.CompilerParams(
            dimension_semantics=("parallel",),   # use both TensorCores on v7x
        ),
    )(x, w3, b3)

    # Row-major metadata-only reshape back to the conv output layout.
    return out4.reshape(B, C_out, L_out)


def _reference(x, weight, bias, *, lr_mul=1.0, activation=False):
    """Pure-JAX reference mirroring the PyTorch forward (independent path)."""
    B, C_in, L = x.shape
    C_out, _, K = weight.shape
    scale = (1.0 / math.sqrt(K)) * lr_mul
    out = lax.conv_general_dilated(
        x, weight * scale,
        window_strides=(1,), padding="VALID",
        dimension_numbers=("NCH", "OIH", "NCH"),
        feature_group_count=C_in,
        precision=lax.Precision.HIGHEST,
    )
    if bias is not None:
        out = out + (bias * lr_mul)[None, :, None]
    if activation:
        out = jnp.where(out >= 0.0, out, 0.2 * out) * math.sqrt(2.0)
    return out


if __name__ == "__main__":
    # Small shapes consistent with the module; L chosen so L_out = 128 (lane-dense).
    B, C_in, C_out, K = 2, 4, 8, 3
    L = 128 + K - 1          # -> L_out = 128
    lr_mul = 0.01
    bias_init = 0.1

    key = jax.random.PRNGKey(0)
    kx, kw = jax.random.split(key)

    # Matches __init__: weight = randn(C_out, 1, K)/lr_mul ; bias = full(C_out, bias_init)
    weight = jax.random.normal(kw, (C_out, 1, K), dtype=jnp.float32) / lr_mul
    bias = jnp.full((C_out,), bias_init, dtype=jnp.float32)
    x = jax.random.normal(kx, (B, C_in, L), dtype=jnp.float32)

    ok = True
    for activation in (False, True):
        out = equal_conv1d_group(x, weight, bias, lr_mul=lr_mul, activation=activation)
        out = jax.block_until_ready(out)
        ref = _reference(x, weight, bias, lr_mul=lr_mul, activation=activation)
        if not bool(jnp.allclose(out, ref, atol=1e-4, rtol=1e-4)):
            ok = False

    if ok:
        print("KERNEL_OK")
    else:
        print("KERNEL_MISMATCH")
</pallas_src>

<mosaic_0001>
module attributes {stable_mosaic.version = 11 : i64} {
  func.func @_equal_conv1d_group_kernel(%arg0: i32, %arg1: memref<1x4x130xf32, #tpu.memory_space<vmem>>, %arg2: memref<4x2x3xf32, #tpu.memory_space<vmem>>, %arg3: memref<4x2x1xf32, #tpu.memory_space<vmem>>, %arg4: memref<1x4x2x128xf32, #tpu.memory_space<vmem>>) attributes {dimension_semantics = [#tpu.dimension_semantics<parallel>], iteration_bounds = array<i64: 2>, scalar_prefetch = 0 : i64, scratch_operands = 0 : i64, tpu.core_type = #tpu.core_type<tc>, window_params = [{transform_indices = @transform_0, window_bounds = array<i64: 1, 4, 130>}, {pipeline_mode = #tpu.pipeline_mode<synchronous>, transform_indices = @transform_1, window_bounds = array<i64: 4, 2, 3>}, {pipeline_mode = #tpu.pipeline_mode<synchronous>, transform_indices = @transform_2, window_bounds = array<i64: 4, 2, 1>}, {transform_indices = @transform_3, window_bounds = array<i64: 1, 4, 2, 128>}]} {
    %c0 = arith.constant 0 : index
    %c0_0 = arith.constant 0 : index
    %c0_1 = arith.constant 0 : index
    %0 = vector.load %arg1[%c0, %c0_0, %c0_1] : memref<1x4x130xf32, #tpu.memory_space<vmem>>, vector<1x4x130xf32>
    %c0_2 = arith.constant 0 : index
    %c0_3 = arith.constant 0 : index
    %c0_4 = arith.constant 0 : index
    %1 = vector.load %arg2[%c0_2, %c0_3, %c0_4] : memref<4x2x3xf32, #tpu.memory_space<vmem>>, vector<4x2x3xf32>
    %cst = arith.constant 0.00577350287 : f32
    %2 = vector.broadcast %cst : f32 to vector<4x2x3xf32>
    %3 = arith.mulf %1, %2 : vector<4x2x3xf32>
    %4 = vector.extract_strided_slice %0 {offsets = [0, 0, 0], sizes = [1, 4, 128], strides = [1, 1, 1]} : vector<1x4x130xf32> to vector<1x4x128xf32>
    %5 = vector.shape_cast %4 : vector<1x4x128xf32> to vector<1x4x1x128xf32>
    %6 = vector.extract_strided_slice %3 {offsets = [0, 0, 0], sizes = [4, 2, 1], strides = [1, 1, 1]} : vector<4x2x3xf32> to vector<4x2x1xf32>
    %7 = vector.shape_cast %6 : vector<4x2x1xf32> to vector<1x4x2x1xf32>
    %8 = vector.broadcast %5 : vector<1x4x1x128xf32> to vector<1x4x2x128xf32>
    %9 = vector.broadcast %7 : vector<1x4x2x1xf32> to vector<1x4x2x128xf32>
    %10 = arith.mulf %8, %9 : vector<1x4x2x128xf32>
    %11 = vector.extract_strided_slice %0 {offsets = [0, 0, 1], sizes = [1, 4, 128], strides = [1, 1, 1]} : vector<1x4x130xf32> to vector<1x4x128xf32>
    %12 = vector.shape_cast %11 : vector<1x4x128xf32> to vector<1x4x1x128xf32>
    %13 = vector.extract_strided_slice %3 {offsets = [0, 0, 1], sizes = [4, 2, 1], strides = [1, 1, 1]} : vector<4x2x3xf32> to vector<4x2x1xf32>
    %14 = vector.shape_cast %13 : vector<4x2x1xf32> to vector<1x4x2x1xf32>
    %15 = vector.broadcast %12 : vector<1x4x1x128xf32> to vector<1x4x2x128xf32>
    %16 = vector.broadcast %14 : vector<1x4x2x1xf32> to vector<1x4x2x128xf32>
    %17 = arith.mulf %15, %16 : vector<1x4x2x128xf32>
    %18 = arith.addf %10, %17 : vector<1x4x2x128xf32>
    %19 = vector.extract_strided_slice %0 {offsets = [0, 0, 2], sizes = [1, 4, 128], strides = [1, 1, 1]} : vector<1x4x130xf32> to vector<1x4x128xf32>
    %20 = vector.shape_cast %19 : vector<1x4x128xf32> to vector<1x4x1x128xf32>
    %21 = vector.extract_strided_slice %3 {offsets = [0, 0, 2], sizes = [4, 2, 1], strides = [1, 1, 1]} : vector<4x2x3xf32> to vector<4x2x1xf32>
    %22 = vector.shape_cast %21 : vector<4x2x1xf32> to vector<1x4x2x1xf32>
    %23 = vector.broadcast %20 : vector<1x4x1x128xf32> to vector<1x4x2x128xf32>
    %24 = vector.broadcast %22 : vector<1x4x2x1xf32> to vector<1x4x2x128xf32>
    %25 = arith.mulf %23, %24 : vector<1x4x2x128xf32>
    %26 = arith.addf %18, %25 : vector<1x4x2x128xf32>
    %c0_5 = arith.constant 0 : index
    %c0_6 = arith.constant 0 : index
    %c0_7 = arith.constant 0 : index
    %27 = vector.load %arg3[%c0_5, %c0_6, %c0_7] : memref<4x2x1xf32, #tpu.memory_space<vmem>>, vector<4x2x1xf32>
    %28 = vector.shape_cast %27 : vector<4x2x1xf32> to vector<1x4x2x1xf32>
    %cst_8 = arith.constant 0.00999999977 : f32
    %29 = vector.broadcast %cst_8 : f32 to vector<1x4x2x1xf32>
    %30 = arith.mulf %28, %29 : vector<1x4x2x1xf32>
    %31 = vector.broadcast %30 : vector<1x4x2x1xf32> to vector<1x4x2x128xf32>
    %32 = arith.addf %26, %31 : vector<1x4x2x128xf32>
    %c0_9 = arith.constant 0 : index
    %c0_10 = arith.constant 0 : index
    %c0_11 = arith.constant 0 : index
    %c0_12 = arith.constant 0 : index
    %33 = vector.load %arg4[%c0_9, %c0_10, %c0_11, %c0_12] : memref<1x4x2x128xf32, #tpu.memory_space<vmem>>, vector<1x4x2x128xf32>
    tpu.vector_store %arg4[%c0_9, %c0_10, %c0_11, %c0_12], %32 {strides = array<i32>} : memref<1x4x2x128xf32, #tpu.memory_space<vmem>>, vector<1x4x2x128xf32>,
    return
  }
  func.func @transform_0(%arg0: i32) -> (i32, i32, i32) {
    %c0_i32 = arith.constant 0 : i32
    %c0_i32_0 = arith.constant 0 : i32
    %c0_i32_1 = arith.constant 0 : i32
    return %arg0, %c0_i32, %c0_i32_0 : i32, i32, i32
  }
  func.func @transform_1(%arg0: i32) -> (i32, i32, i32) {
    %c0_i32 = arith.constant 0 : i32
    %c0_i32_0 = arith.constant 0 : i32
    %c0_i32_1 = arith.constant 0 : i32
    %c0_i32_2 = arith.constant 0 : i32
    return %c0_i32, %c0_i32_0, %c0_i32_1 : i32, i32, i32
  }
  func.func @transform_2(%arg0: i32) -> (i32, i32, i32) {
    %c0_i32 = arith.constant 0 : i32
    %c0_i32_0 = arith.constant 0 : i32
    %c0_i32_1 = arith.constant 0 : i32
    %c0_i32_2 = arith.constant 0 : i32
    return %c0_i32, %c0_i32_0, %c0_i32_1 : i32, i32, i32
  }
  func.func @transform_3(%arg0: i32) -> (i32, i32, i32, i32) {
    %c0_i32 = arith.constant 0 : i32
    %c0_i32_0 = arith.constant 0 : i32
    %c0_i32_1 = arith.constant 0 : i32
    %c0_i32_2 = arith.constant 0 : i32
    return %arg0, %c0_i32, %c0_i32_0, %c0_i32_1 : i32, i32, i32, i32
  }
}

</mosaic_0001>

<bundles_post_ra>
// kernel: tpu_custom_call.1
= control target key start
LH: loop header
LB: loop body
LE: loop exit
PB: predicated region body
PF: predicated region fallthrough
CT: control target
= control target key end

     0   :  { %8 = vsyncpa [#allocation3], 0  ;;  %s821_s0 = inlined_call_operand.vmem [shape: f32[2,4,130], index: 0, kind: input, shape index: {}]   ;;  %s822_s1 = inlined_call_operand.vmem [shape: f32[4,2,3], index: 1, kind: input, shape index: {}]   ;;  %s823_s2 = inlined_call_operand.vmem [shape: f32[4,2,1], index: 2, kind: input, shape index: {}]   ;;  %s824_s3 = inlined_call_operand.hbm [shape: f32[2,4,2,128], index: 3, kind: output, shape index: {}]  }
   0x1   :  { %10 = vsyncpa [#allocation3 + $0x1], 0  ;;  %s662_s12 = smov 0   ;;  %s664_s13 = smov 0  }
   0x2   :  { %s666_s14 = smov 0   ;;  %s668_s15 = smov 0  }
   0x3 LB: > { %s683_s16 = sadd.s32 4294967295, %s631_s15   ;;  %s501_s17 = sadd.s32 4294967294, %s631_s15   ;;  %s631_s15 = sphi %s668_s15, %s830_s15   ;;  %s627_s14 = sphi %s666_s14, %s829_s14   ;;  %s623_s13 = sphi %s664_s13, %s828_s13   ;;  %s619_s12 = sphi %s662_s12, %s827_s12  }
   0x4   : > { %s687_s18 = sadd.s32 1, %s631_s15   ;;  %s91_s19 = sadd.s32 1, %s627_s14 }
   0x5   : > { %s88_s20 = ssub.s32 %s631_s15, %s687_s18  ;;  %p101_p0 = scmp.ne.s32.totalorder %s627_s14, %s623_s13 }
   0x6   : > { %p89_p1 = scmp.eq.s32.totalorder %s88_s20, 0  ;;  %p102_p2 = scmp.eq.s32.totalorder %s683_s16, 1 }
   0x7   : > { %p107_p3 = scmp.ne.s32.totalorder %s623_s13, %s619_s12  ;;  %p108_p4 = scmp.eq.s32.totalorder %s501_s17, 1 }
   0x8   : > { %s698_s21 = scalar_select %p89_p1, %s627_s14, %s91_s19  }
   0x9   : > { %p700_p5 = por %p102_p2, %p101_p0  ;;  %p704_p6 = por %p108_p4, %p107_p3 }
   0xa   : > { %p504_p7 = scmp.ge.s32.totalorder %s631_s15, 1  ;;  %p140_p8 = scmp.lt.s32.totalorder %s631_s15, 3 }
   0xc   : > { %p141_p9 = pnand %p504_p7, %p140_p8 }
   0xd   : > { %v170_v0 = vld [vmem:[%s822_s1] sm:$0x3] (!%p141_p9)  ;;  %v172_v1 = vld [vmem:[%s822_s1 + $0x4] sm:$0x3] (!%p141_p9)  ;;  %v633_v2 = vmov (!%p141_p9), 1   ;;  %v634_v9 = vmov (!%p141_p9), 2   ;;  %v190_v21 = vlaneseq (!%p141_p9) }
   0xe   : > { %144 = sbr.rel (%p141_p9) target bundleno = 309 (0x135), region = 32  ;;  %563 = vset.pattern.permute.xlu0 (!%p141_p9), %v633_v2  ;;  %v174_v3 = vmul.f32 (!%p141_p9), 0.005773503, %v170_v0  ;;  %564 = vset.pattern.permute.xlu1 (!%p141_p9), %v633_v2  ;;  %v176_v4 = vmul.f32 (!%p141_p9), 0.005773503, %v172_v1  ;;  %v635_v11 = vmov (!%p141_p9), 0  }
   0xf   : > { %v171_v5 = vld [vmem:[%s822_s1 + $0x2] sm:$0x3] (!%p141_p9)  ;;  %v173_v6 = vld [vmem:[%s822_s1 + $0x6] sm:$0x3] (!%p141_p9)  ;;  %v389_v10 = vld [vmem:[%s823_s2] sm:$0x3] (!%p141_p9) }
  0x10   : > { %268 = vperm.xlu0 (!%p141_p9), %563, %v174_v3   ;;  %276 = vperm.xlu1 (!%p141_p9), %564, %v176_v4   ;;  %v175_v7 = vmul.f32 (!%p141_p9), 0.005773503, %v171_v5  ;;  %v177_v8 = vmul.f32 (!%p141_p9), 0.005773503, %v173_v6  ;;  %v393_v12 = vmul.f32 (!%p141_p9), 0.01, %v389_v10 }
  0x11   : > { %v391_v13 = vld [vmem:[%s823_s2 + $0x4] sm:$0x3] (!%p141_p9)  ;;  %v390_v15 = vld [vmem:[%s823_s2 + $0x2] sm:$0x3] (!%p141_p9)  ;;  %v392_v17 = vld [vmem:[%s823_s2 + $0x6] sm:$0x3] (!%p141_p9) }
  0x12   : > { %v395_v14 = vmul.f32 (!%p141_p9), 0.01, %v391_v13  ;;  %v394_v16 = vmul.f32 (!%p141_p9), 0.01, %v390_v15  ;;  %v396_v18 = vmul.f32 (!%p141_p9), 0.01, %v392_v17 }
  0x13   : > { %p164_p10 = scmp.lt.s32.totalorder (!%p141_p9), %s683_s16, 1  ;;  %v636_v19 = vmov (!%p141_p9), 1966171168   ;;  %v191_v23 = vshrl.u32 (!%p141_p9), %v190_v21, 7  ;;  %s637_s27 = smov (!%p141_p9), 127   ;;  %vm315_vm0 = vcmask (!%p141_p9), 1039360  }
  0x14   : > { %272 = vperm.xlu0 (!%p141_p9), %563, %v175_v7   ;;  %280 = vperm.xlu1 (!%p141_p9), %564, %v177_v8   ;;  %v188_v20 = vunpack.c.l.s4 (!%p141_p9), %v636_v19  ;;  %s638_s28 = smov (!%p141_p9), 126   ;;  %s161_s29 = sand.u32 (!%p141_p9), 1, %s623_s13   ;;  %vm376_vm1 = vcmask (!%p141_p9), 1031168  }
  0x15   : > { %s165_s19 = scalar_select %p164_p10, %s683_s16, 1  ;;  %v205_v26 = vsub.s32 0, %v191_v23  ;;  %v249_v27 = vsub.s32 1, %v191_v23 }
  0x16   : > { %v189_v22 = vunpack.c.0.s8 %v188_v20  ;;  %s505_s30 = sshll.u32 %s161_s29, 3  ;;  %s515_s6 = sshll.u32 %s683_s16, 7 }
  0x17   : > { %s514_s20 = sshll.u32 %s165_s19, 3  ;;  %s163_s4 = scalar_lea.vmem [#allocation2], %s505_s30 }
  0x18   : > { %565 = vset.pattern.permute.xlu0 %v634_v9  ;;  %566 = vset.pattern.permute.xlu1 %v634_v9  ;;  %s168_s26 = scalar_lea.vmem %s821_s0, %s514_s20  ;;  %v192_v24 = vsub.s32 %v189_v22, %v191_v23  ;;  %s439_s5 = sshll.u32 %s163_s4, 4  ;;  %s771_s5 = int_to_ptr.vmem [resolvable:$true] %s439_s5 }
  0x19   : > { %329 = vperm.xlu0 %565, %v174_v3   ;;  %333 = vperm.xlu1 %566, %v175_v7   ;;  %v508_v25 = vld.sshfl [vmem:[%s168_s26] sm:$0xff pattern:$0x75316420]  ;;  %s776_s9 = scalar_lea.hbm %s824_s3, %s515_s6  ;;  %s780_s10 = scalar_lea.sflag [#allocation3], %s161_s29 }
  0x1a   : > { %v193_v28 = vrot.slane %v508_v25, %v192_v24  ;;  %v186_v29 = vcombine.high %v508_v25, %v508_v25  ;;  %s569_s16 = scalar_lea.vmem %s771_s5, 128  ;;  %s639_s11 = smov [#allocation2]  }
  0x1b   : > { %p570_p11 = scmp.ne.s32.totalorder %s771_s5, %s569_s16  ;;  %s573_s17 = sshll.u32 %s639_s11, 4  ;;  %s574_s17 = int_to_ptr.vmem [resolvable:$false] %s573_s17 }
  0x1c   : > { %v739_v30 = vrot.slane %v193_v28, %v205_v26  ;;  %v250_v31 = vrot.slane %v193_v28, %v249_v27  ;;  %v200_v32 = vrot.slane %v186_v29, %v192_v24  ;;  %v201_v33 = vcombine.high %v193_v28, %v193_v28  ;;  %s575_s19 = scalar_lea.vmem %s574_s17, 256  ;;  %p576_p0 = scmp.lt.s32.totalorder %s771_s5, %s574_s17 }
  0x1d   : > { %341 = vperm.xlu0 %565, %v177_v8   ;;  %337 = vperm.xlu1 %566, %v176_v4   ;;  %p571_p12 = pnand %p570_p11, %p700_p5  ;;  %p577_p1 = scmp.lt.s32.totalorder %s575_s19, %s569_s16 }
  0x1e   : > { %v742_v37 = vrot.slane %v200_v32, %v205_v26  ;;  %v254_v38 = vrot.slane %v200_v32, %v249_v27  ;;  %v744_v39 = vrot.slane %v201_v33, %v205_v26  ;;  %v258_v40 = vrot.slane %v201_v33, %v249_v27 }
  0x1f   : > { %v202_v45 = vcombine.high %v200_v32, %v200_v32  ;;  %p572_p13 = pneg %p571_p12  ;;  %p578_p2 = por %p577_p1, %p576_p0 }
  0x21   : > { %567 = vset.pattern.permute.xlu1 %v635_v11  ;;  %568 = vset.pattern.permute.xlu0 %v635_v11  ;;  %v748_v48 = vrot.slane %v202_v45, %v205_v26  ;;  %v262_v49 = vrot.slane %v202_v45, %v249_v27  ;;  %p579_p3 = pnand %p578_p2, %p572_p13 }
  0x22   : > { %225 = vperm.xlu1 %567, %v174_v3   ;;  %230 = vperm.xlu0 %568, %v175_v7  }
  0x26   : > { %235 = vperm.xlu1 %567, %v176_v4   ;;  %399 = vperm.xlu0 %568, %v393_v12  }
  0x2a   : > { %240 = vperm.xlu1 %567, %v177_v8   ;;  %409 = vperm.xlu0 %568, %v395_v14  }
  0x2e   : > { %404 = vperm.xlu1 %567, %v394_v16  }
  0x32   : > { %414 = vperm.xlu1 %567, %v396_v18  }
  0x8f   : > { %v269_v34 = vpop.permute.xlu0 %268  ;;  %v277_v41 = vpop.permute.xlu1 %276 }
  0x90   : > { %v283_v35 = vmul.f32 %v269_v34, %v739_v30  ;;  %v284_v36 = vmul.f32 %v269_v34, %v250_v31  ;;  %v287_v46 = vmul.f32 %v277_v41, %v744_v39  ;;  %v288_v47 = vmul.f32 %v277_v41, %v258_v40 }
  0x92   : > { %301 = vrot.lane.b32.xlu1 %v284_v36, %s637_s27  ;;  %299 = vrot.lane.b32.xlu0 %v283_v35, %s637_s27 }
  0x93   : > { %v273_v42 = vpop.permute.xlu0 %272  ;;  %v281_v50 = vpop.permute.xlu1 %280 }
  0x94   : > { %v285_v43 = vmul.f32 %v273_v42, %v742_v37  ;;  %v286_v44 = vmul.f32 %v273_v42, %v254_v38  ;;  %v289_v51 = vmul.f32 %v281_v50, %v748_v48  ;;  %v290_v52 = vmul.f32 %v281_v50, %v262_v49 }
  0x96   : > { %305 = vrot.lane.b32.xlu1 %v286_v44, %s637_s27  ;;  %303 = vrot.lane.b32.xlu0 %v285_v43, %s637_s27 }
  0x98   : > { %v330_v53 = vpop.permute.xlu0 %329  ;;  %v334_v56 = vpop.permute.xlu1 %333 }
  0x99   : > { %v344_v54 = vmul.f32 %v330_v53, %v739_v30  ;;  %v345_v55 = vmul.f32 %v330_v53, %v250_v31  ;;  %v346_v57 = vmul.f32 %v334_v56, %v742_v37  ;;  %v347_v58 = vmul.f32 %v334_v56, %v254_v38 }
  0x9a   : > { %309 = vrot.lane.b32.xlu1 %v288_v47, %s637_s27  ;;  %307 = vrot.lane.b32.xlu0 %v287_v46, %s637_s27 }
  0x9c   : > { %v338_v59 = vpop.permute.xlu1 %337  ;;  %v342_v62 = vpop.permute.xlu0 %341 }
  0x9d   : > { %v348_v60 = vmul.f32 %v338_v59, %v744_v39  ;;  %v349_v61 = vmul.f32 %v338_v59, %v258_v40  ;;  %v350_v63 = vmul.f32 %v342_v62, %v748_v48  ;;  %v351_v0 = vmul.f32 %v342_v62, %v262_v49 }
  0x9e   : > { %313 = vrot.lane.b32.xlu1 %v290_v52, %s637_s27  ;;  %311 = vrot.lane.b32.xlu0 %v289_v51, %s637_s27 }
  0xa1   : > { %v226_v1 = vpop.permute.xlu1 %225  ;;  %v231_v4 = vpop.permute.xlu0 %230 }
  0xa2   : > { %362 = vrot.lane.b32.xlu1 %v345_v55, %s638_s28  ;;  %360 = vrot.lane.b32.xlu0 %v344_v54, %s638_s28  ;;  %v243_v18 = vmul.f32 %v226_v1, %v739_v30  ;;  %v244_v24 = vmul.f32 %v231_v4, %v742_v37 }
  0xa5   : > { %v236_v2 = vpop.permute.xlu1 %235  ;;  %v400_v6 = vpop.permute.xlu0 %399 }
  0xa6   : > { %366 = vrot.lane.b32.xlu1 %v347_v58, %s638_s28  ;;  %364 = vrot.lane.b32.xlu0 %v346_v57, %s638_s28  ;;  %v245_v32 = vmul.f32 %v236_v2, %v744_v39 }
  0xa9   : > { %v241_v3 = vpop.permute.xlu1 %240  ;;  %v410_v8 = vpop.permute.xlu0 %409 }
  0xaa   : > { %370 = vrot.lane.b32.xlu1 %v349_v61, %s638_s28  ;;  %368 = vrot.lane.b32.xlu0 %v348_v60, %s638_s28  ;;  %v246_v41 = vmul.f32 %v241_v3, %v748_v48 }
  0xad   : > { %v405_v5 = vpop.permute.xlu1 %404 }
  0xae   : > { %374 = vrot.lane.b32.xlu1 %v351_v0, %s638_s28  ;;  %372 = vrot.lane.b32.xlu0 %v350_v63, %s638_s28 }
  0xb1   : > { %v415_v7 = vpop.permute.xlu1 %414 }
 0x104   : > { %v302_v9 = vpop.permute.xlu1 %301  ;;  %v300_v10 = vpop.permute.xlu0 %299 }
 0x105   : > { %v316_v17 = vsel %vm315_vm0, %v300_v10, %v302_v9 }
 0x106   : > { %v324_v19 = vadd.f32 %v316_v17, %v243_v18 }
 0x108   : > { %v306_v11 = vpop.permute.xlu1 %305  ;;  %v304_v12 = vpop.permute.xlu0 %303 }
 0x109   : > { %v317_v22 = vsel %vm315_vm0, %v304_v12, %v306_v11 }
 0x10a   : > { %v325_v26 = vadd.f32 %v317_v22, %v244_v24 }
 0x10c   : > { %v310_v13 = vpop.permute.xlu1 %309  ;;  %v308_v14 = vpop.permute.xlu0 %307 }
 0x10d   : > { %v318_v31 = vsel %vm315_vm0, %v308_v14, %v310_v13 }
 0x10e   : > { %v326_v34 = vadd.f32 %v318_v31, %v245_v32 }
 0x110   : > { %v314_v15 = vpop.permute.xlu1 %313  ;;  %v312_v16 = vpop.permute.xlu0 %311 }
 0x111   : > { %v319_v37 = vsel %vm315_vm0, %v312_v16, %v314_v15 }
 0x112   : > { %v327_v43 = vadd.f32 %v319_v37, %v246_v41 }
 0x114   : > { %v363_v20 = vpop.permute.xlu1 %362  ;;  %v361_v21 = vpop.permute.xlu0 %360 }
 0x115   : > { %v377_v23 = vsel %vm376_vm1, %v361_v21, %v363_v20 }
 0x116   : > { %v385_v25 = vadd.f32 %v377_v23, %v324_v19 }
 0x118   : > { %v417_v27 = vadd.f32 %v400_v6, %v385_v25  ;;  %v367_v28 = vpop.permute.xlu1 %366  ;;  %v365_v29 = vpop.permute.xlu0 %364 }
 0x119   : > { %v378_v30 = vsel %vm376_vm1, %v365_v29, %v367_v28 }
 0x11a   : > { %421 = vst [vmem:[%s163_s4] sm:$0x3] %v417_v27  ;;  %v386_v33 = vadd.f32 %v378_v30, %v325_v26 }
 0x11c   : > { %v418_v35 = vadd.f32 %v405_v5, %v386_v33  ;;  %v371_v36 = vpop.permute.xlu1 %370  ;;  %v369_v38 = vpop.permute.xlu0 %368 }
 0x11d   : > { %v379_v40 = vsel %vm376_vm1, %v369_v38, %v371_v36 }
 0x11e   : > { %422 = vst [vmem:[%s163_s4 + $0x2] sm:$0x3] %v418_v35  ;;  %v387_v42 = vadd.f32 %v379_v40, %v326_v34 }
 0x120   : > { %v419_v39 = vadd.f32 %v410_v8, %v387_v42  ;;  %v375_v44 = vpop.permute.xlu1 %374  ;;  %v373_v45 = vpop.permute.xlu0 %372 }
 0x121   : > { %v380_v46 = vsel %vm376_vm1, %v373_v45, %v375_v44 }
 0x122   : > { %423 = vst [vmem:[%s163_s4 + $0x4] sm:$0x3] %v419_v39  ;;  %v388_v47 = vadd.f32 %v380_v46, %v327_v43 }
 0x124   : > { %v420_v48 = vadd.f32 %v415_v7, %v388_v47 }
 0x126   : > { %424 = vst [vmem:[%s163_s4 + $0x6] sm:$0x3] %v420_v48 }
 0x127   : > { %582 = shalt.err (!%p579_p3)
}
 0x128   : > { %s583_s20 = scalar_lea.hbm %s776_s9, 128  ;;  %s587_s26 = scalar_lea.hbm %s824_s3, 256 }
 0x129   : > { %p584_p4 = scmp.ne.s32.totalorder %s776_s9, %s583_s20  ;;  %p588_p9 = scmp.lt.u32.totalorder %s776_s9, %s824_s3 }
 0x12a   : > { %p589_p10 = scmp.lt.u32.totalorder %s587_s26, %s583_s20  ;;  %p591_p12 = scmp.lt.u32.totalorder %s583_s20, %s776_s9 }
 0x12b   : > { %p585_p7 = pnand %p584_p4, %p700_p5 }
 0x12c   : > { %p590_p11 = por %p589_p10, %p588_p9 }
 0x12d   : > { %p586_p8 = pneg %p585_p7 }
 0x12e   : > { %p592_p13 = por %p591_p12, %p590_p11 }
 0x130   : > { %p593_p0 = pnand %p592_p13, %p586_p8 }
 0x132   : > { %596 = shalt.err (!%p593_p0)
}
 0x133   : > { %s640_s29 = smov 32   ;;  %s641_s30 = smov 2  }
 0x134   : > { %516 = dma.vmem_to_hbm [thread:$0]  (%p700_p5), %s771_s5, 128, %s776_s9, %s780_s10, %s640_s29, %s640_s29, %s641_s30  }
 0x135 PF: > { %p522_p1 = scmp.ge.s32.totalorder %s631_s15, 2  ;;  %s454_s4 = sand.u32 1, %s619_s12  }
 0x136   : > { %s455_s6 = scalar_lea.sflag [#allocation3], %s454_s4 }
 0x137   : > { %p519_p2 = pnand %p522_p1, %p704_p6 }
 0x139   : > { %614 = dma.done.wait (!%p519_p2), %s455_s6, 128  }
 0x13a   : > { %616 = vsyncadd (!%p519_p2), %s455_s6, 4294967168  ;;  %p13_p3 = scmp.ge.s32.totalorder %s687_s18, 4   ;;  %s827_s12 = smov %s623_s13 }
 0x13b   : > { %s828_s13 = smov %s627_s14  ;;  %s829_s14 = smov %s698_s21 }
 0x13c   : > { %s830_s15 = smov %s687_s18  ;;  %15 = sbr.rel (!%p13_p3) target bundleno = 3 (0x3), region = 67 }
 0x143   :  { %460 = vsyncpa [#allocation3], 1 }
 0x144   :  { %462 = vsyncpa [#allocation3 + $0x1], 1 }

</bundles_post_ra>
